<compile_context>
chip_gen: v5e
topology: v5e:2x2
jax: 0.10.0
libtpu: 0.0.40
codegen_flags: <defaults>
</compile_context>

<pallas_src>
import functools

import jax
import jax.numpy as jnp
from jax.experimental import pallas as pl
from jax.experimental.pallas import tpu as pltpu


# ----------------------------- Pallas kernel --------------------------------
def _adaconvview_kernel(w_ref, m_ref, x_ref, o_ref, *, offsets, act, compute_dtype):
    """One (batch, P-tile) grid step.

    w_ref: (T, C_out, F)   per-tap flattened weights (T == 1 except fused k>1 path)
    m_ref: (1, span)       pooling mask: 1/P at valid columns, 0 at junk columns
    x_ref: (1, F, L)       one batch element's features; offsets+span stay within L
    o_ref: (1, 1, C_out)   pooled output, accumulated across the P-tile ("arbitrary") axis
    """
    p_idx = pl.program_id(1)

    @pl.when(p_idx == 0)
    def _init():
        o_ref[...] = jnp.zeros_like(o_ref)

    span = m_ref.shape[-1]
    x = x_ref[0]                                   # (F, L)
    if compute_dtype is not None:
        x = x.astype(compute_dtype)                # in-kernel cast: zero extra HBM traffic

    z = None
    for t, off in enumerate(offsets):              # static unroll: k*k taps (or 1)
        w_t = w_ref[t]                             # (C_out, F)
        if compute_dtype is not None:
            w_t = w_t.astype(compute_dtype)
        contrib = jnp.dot(w_t, x[:, off:off + span],
                          preferred_element_type=jnp.float32)   # MXU, f32 accumulation
        z = contrib if z is None else z + contrib  # (C_out, span)

    if act == "relu":
        z = jnp.maximum(z, 0.0)
    elif act == "relu6":
        z = jnp.clip(z, 0.0, 6.0)
    # act == "none": identity

    z = z * m_ref[...]                             # zero junk columns + fold in 1/P (VPU)
    pooled = jnp.sum(z, axis=-1)                   # (C_out,) cross-lane reduce (XLU)
    o_ref[...] += pooled.reshape(o_ref.shape)


# --------------------------- host-side plumbing ------------------------------
def _pick_p_tile(P, target=8192):
    """Largest tile of the flattened-spatial axis: <= target, multiple of 128 (no partial
    blocks), dividing P; falls back to P (single tile) when no such divisor exists."""
    if P <= target:
        return P
    t = (target // 128) * 128
    while t >= 128:
        if P % t == 0:
            return t
        t -= 128
    return P


def _im2col_batch_major(x, k, s, p, d):
    """(N, C, H, W) -> (N, C*k*k, OH*OW) patches, feature order [C, kh, kw]
    (matches weight.reshape(C_out, C_in*k*k)). Only used for stride > 1."""
    N, C, H, W = x.shape
    if p > 0:
        x = jnp.pad(x, ((0, 0), (0, 0), (p, p), (p, p)))
    Hp, Wp = H + 2 * p, W + 2 * p
    OH = (Hp - d * (k - 1) - 1) // s + 1
    OW = (Wp - d * (k - 1) - 1) // s + 1
    cols = []
    for kh in range(k):
        for kw in range(k):
            cols.append(x[:, :,
                          kh * d: kh * d + s * (OH - 1) + 1: s,
                          kw * d: kw * d + s * (OW - 1) + 1: s])   # (N, C, OH, OW)
    pat = jnp.stack(cols, axis=2)                                   # (N, C, k*k, OH, OW)
    return pat.reshape(N, C * k * k, OH * OW), (OH, OW)


@functools.partial(jax.jit, static_argnames=(
    "ksize", "stride", "padding", "dilation", "groups", "active", "compute_dtype"))
def ada_conv_view(x, weight, *, ksize=1, stride=1, padding=0, dilation=1,
                  groups=1, active="relu", compute_dtype=None):
    """AdaConvView.forward (isview=True): conv KxK (bias=False) -> active -> global avg pool.

    x:      (N, C_in, H, W) float, NCHW.  Pass bf16 x to halve the dominant HBM stream.
    weight: (C_out, C_in, k, k) float (PyTorch conv weight).
    compute_dtype: optional dtype (e.g. jnp.bfloat16) for the matmul operands; the cast
                   happens inside the kernel, accumulation stays f32.
    Returns (N, C_out) float32.
    """
    if groups != 1:
        # TODO(synk): grouped conv ('gcu' / groups > 1) not implemented.
        raise NotImplementedError("ada_conv_view only supports groups=1")
    if active not in ("relu", "relu6", "none"):
        raise ValueError(f"unsupported activation: {active}")
    # TODO(synk): isview=False (ReturnX) variant returns the full feature map; not implemented.

    N, C_in, H, W = x.shape
    C_out = weight.shape[0]
    k, s, p, d = ksize, stride, padding, dilation

    if k == 1 and s == 1 and p == 0 and d == 1:
        # 1x1 fast path: free reshape of contiguous NCHW, no im2col, no host transpose.
        P = H * W
        x_cols = x.reshape(N, C_in, P)
        w_taps = weight.reshape(1, C_out, C_in)
        offsets = (0,)
        feat = C_in
        pt = _pick_p_tile(P)
        n_pt, span, L_block = P // pt, pt, pt
        mask = jnp.full((1, P), 1.0 / P, dtype=jnp.float32)
        x_spec = pl.BlockSpec((1, C_in, pt), lambda n, pi: (n, 0, pi))
        m_spec = pl.BlockSpec((1, pt), lambda n, pi: (0, pi))
    elif s == 1:
        # k>1, stride 1: sum of k*k shifted 1x1 convs on the flattened padded image.
        # x is read from HBM exactly once (no k^2 im2col); junk columns (w >= OW) are
        # killed by the pooling mask before the spatial mean.
        xp = jnp.pad(x, ((0, 0), (0, 0), (p, p), (p, p))) if p > 0 else x
        Hp, Wp = H + 2 * p, W + 2 * p
        OH, OW = Hp - d * (k - 1), Wp - d * (k - 1)
        if OH <= 0 or OW <= 0:
            raise ValueError("kernel/dilation too large for the padded input")
        P = OH * OW
        span = (OH - 1) * Wp + OW
        x_cols = xp.reshape(N, C_in, Hp * Wp)
        w_taps = jnp.transpose(weight, (2, 3, 0, 1)).reshape(k * k, C_out, C_in)
        offsets = tuple(kh * d * Wp + kw * d for kh in range(k) for kw in range(k))
        valid = (jnp.arange(span, dtype=jnp.int32) % Wp) < OW
        mask = (valid.astype(jnp.float32) / P).reshape(1, span)
        feat, n_pt, L_block = C_in, 1, Hp * Wp
        x_spec = pl.BlockSpec((1, C_in, L_block), lambda n, pi: (n, 0, 0))
        m_spec = pl.BlockSpec((1, span), lambda n, pi: (0, 0))
        # TODO(synk): for very large padded images, tile the spatial axis with halos.
    else:
        # stride > 1: batch-major host im2col fallback, same kernel with a single tap.
        x_cols, (OH, OW) = _im2col_batch_major(x, k, s, p, d)     # (N, F, P)
        P = OH * OW
        feat = C_in * k * k
        w_taps = weight.reshape(1, C_out, feat)
        offsets = (0,)
        pt = _pick_p_tile(P)
        n_pt, span, L_block = P // pt, pt, pt
        mask = jnp.full((1, P), 1.0 / P, dtype=jnp.float32)
        x_spec = pl.BlockSpec((1, feat, pt), lambda n, pi: (n, 0, pi))
        m_spec = pl.BlockSpec((1, pt), lambda n, pi: (0, pi))
        # TODO(synk): fuse striding into the kernel (Element-offset grid over taps) to
        # avoid the k^2 im2col HBM amplification for strided convs too.

    w_spec = pl.BlockSpec(w_taps.shape, lambda n, pi: (0, 0, 0))
    out_spec = pl.BlockSpec((1, 1, C_out), lambda n, pi: (n, 0, 0))

    # Explicit scoped-VMEM limit (v5e default is only 16 MiB) and a cost hint for XLA.
    in_item = jnp.dtype(x_cols.dtype).itemsize
    w_item = jnp.dtype(w_taps.dtype).itemsize
    x_blk_bytes = feat * L_block * in_item
    z_bytes = C_out * span * 4
    vmem_need = (2 * (x_blk_bytes + span * 4 + C_out * 4)
                 + w_taps.size * w_item + 4 * z_bytes + (2 << 20))
    vmem_limit = int(min(max(vmem_need, 16 << 20), 32 << 20))

    flops = 2 * N * len(offsets) * C_out * feat * span + 2 * N * C_out * span
    bytes_accessed = (x_cols.size * in_item + w_taps.size * w_item
                      + mask.size * 4 + N * C_out * 4)

    out = pl.pallas_call(
        functools.partial(_adaconvview_kernel, offsets=offsets, act=active,
                          compute_dtype=compute_dtype),
        out_shape=jax.ShapeDtypeStruct((N, 1, C_out), jnp.float32),
        grid=(N, n_pt),
        in_specs=[w_spec, m_spec, x_spec],
        out_specs=out_spec,
        compiler_params=pltpu.CompilerParams(
            dimension_semantics=("parallel", "arbitrary"),
            vmem_limit_bytes=vmem_limit),
        cost_estimate=pl.CostEstimate(flops=int(flops), transcendentals=0,
                                      bytes_accessed=int(bytes_accessed)),
    )(w_taps, mask, x_cols)

    return out.reshape(N, C_out)


# ------------------------------- reference ----------------------------------
def _reference(x, weight, *, ksize=1, stride=1, padding=0, dilation=1, active="relu"):
    y = jax.lax.conv_general_dilated(
        x, weight,
        window_strides=(stride, stride),
        padding=[(padding, padding), (padding, padding)],
        rhs_dilation=(dilation, dilation),
        dimension_numbers=("NCHW", "OIHW", "NCHW"))
    if active == "relu":
        y = jnp.maximum(y, 0.0)
    elif active == "relu6":
        y = jnp.clip(y, 0.0, 6.0)
    return jnp.mean(y, axis=(2, 3))                # (N, C_out)


# --------------------------------- main --------------------------------------
if __name__ == "__main__":
    key = jax.random.PRNGKey(0)
    kx, kw1, kw3 = jax.random.split(key, 3)

    # Module defaults: indepth=4, outdepth=32, ksize=1, stride=1, padding=0,
    # dilation=1, groups=1, active='relu', isview=True.
    N, C_in, H, W = 2, 4, 16, 16
    C_out = 32

    x = jax.random.normal(kx, (N, C_in, H, W), dtype=jnp.float32)

    def _uniform_weight(k_, key_):
        fan_in = C_in * k_ * k_
        bound = (6.0 / fan_in) ** 0.5
        return jax.random.uniform(key_, (C_out, C_in, k_, k_),
                                  minval=-bound, maxval=bound, dtype=jnp.float32)

    # 1) Default config: 1x1 conv -> relu -> adaptive avg pool -> view.
    w1 = _uniform_weight(1, kw1)
    out = jax.block_until_ready(ada_conv_view(x, w1, ksize=1))
    ref = _reference(x, w1, ksize=1)
    assert out.shape == (N, C_out), out.shape
    assert jnp.allclose(out, ref, atol=1e-4, rtol=1e-4), float(jnp.max(jnp.abs(out - ref)))

    # 2) 3x3 / padding=1 (fused shift-and-accumulate path: x read once from HBM).
    w3 = _uniform_weight(3, kw3)
    out3 = jax.block_until_ready(ada_conv_view(x, w3, ksize=3, padding=1))
    ref3 = _reference(x, w3, ksize=3, padding=1)
    assert jnp.allclose(out3, ref3, atol=1e-4, rtol=1e-4), float(jnp.max(jnp.abs(out3 - ref3)))

    # 3) stride=2 fallback (batch-major im2col, same kernel).
    out_s2 = jax.block_until_ready(ada_conv_view(x, w3, ksize=3, stride=2, padding=1))
    ref_s2 = _reference(x, w3, ksize=3, stride=2, padding=1)
    assert jnp.allclose(out_s2, ref_s2, atol=1e-4, rtol=1e-4), \
        float(jnp.max(jnp.abs(out_s2 - ref_s2)))

    # 4) bf16 matmul operands (cast in-kernel; f32 accumulation).
    out_bf = jax.block_until_ready(ada_conv_view(x, w1, ksize=1, compute_dtype=jnp.bfloat16))
    assert jnp.allclose(out_bf, ref, atol=5e-2, rtol=5e-2), float(jnp.max(jnp.abs(out_bf - ref)))

    print("KERNEL_OK")
</pallas_src>

<mosaic_0001>
module attributes {stable_mosaic.version = 11 : i64} {
  func.func @_adaconvview_kernel(%arg0: i32, %arg1: i32, %arg2: memref<1x32x4xf32, #tpu.memory_space<vmem>>, %arg3: memref<1x256xf32, #tpu.memory_space<vmem>>, %arg4: memref<1x4x256xf32, #tpu.memory_space<vmem>>, %arg5: memref<1x1x32xf32, #tpu.memory_space<vmem>>) attributes {dimension_semantics = [#tpu.dimension_semantics<parallel>, #tpu.dimension_semantics<arbitrary>], iteration_bounds = array<i64: 2, 1>, scalar_prefetch = 0 : i64, scratch_operands = 0 : i64, tpu.core_type = #tpu.core_type<tc>, window_params = [{pipeline_mode = #tpu.pipeline_mode<synchronous>, transform_indices = @transform_0, window_bounds = array<i64: 1, 32, 4>}, {transform_indices = @transform_1, window_bounds = array<i64: 1, 256>}, {transform_indices = @transform_2, window_bounds = array<i64: 1, 4, 256>}, {transform_indices = @transform_3, window_bounds = array<i64: 1, 1, 32>}]} {
    %c0_i32 = arith.constant 0 : i32
    %0 = arith.cmpi eq, %arg1, %c0_i32 : i32
    %1 = arith.extui %0 : i1 to i32
    %c0_i32_0 = arith.constant 0 : i32
    %2 = arith.cmpi ne, %1, %c0_i32_0 : i32
    scf.if %2 {
      %cst_16 = arith.constant 0.000000e+00 : f32
      %18 = vector.broadcast %cst_16 : f32 to vector<1x1x32xf32>
      %c0_17 = arith.constant 0 : index
      %c0_18 = arith.constant 0 : index
      %c0_19 = arith.constant 0 : index
      %19 = vector.load %arg5[%c0_17, %c0_18, %c0_19] : memref<1x1x32xf32, #tpu.memory_space<vmem>>, vector<1x1x32xf32>
      tpu.vector_store %arg5[%c0_17, %c0_18, %c0_19], %18 {strides = array<i32>} : memref<1x1x32xf32, #tpu.memory_space<vmem>>, vector<1x1x32xf32>,
    } else {
    }
    %c0 = arith.constant 0 : index
    %c0_1 = arith.constant 0 : index
    %c0_2 = arith.constant 0 : index
    %3 = vector.load %arg4[%c0, %c0_1, %c0_2] : memref<1x4x256xf32, #tpu.memory_space<vmem>>, vector<1x4x256xf32>
    %4 = vector.shape_cast %3 : vector<1x4x256xf32> to vector<4x256xf32>
    %c0_3 = arith.constant 0 : index
    %c0_4 = arith.constant 0 : index
    %c0_5 = arith.constant 0 : index
    %5 = vector.load %arg2[%c0_3, %c0_4, %c0_5] : memref<1x32x4xf32, #tpu.memory_space<vmem>>, vector<1x32x4xf32>
    %6 = vector.shape_cast %5 : vector<1x32x4xf32> to vector<32x4xf32>
    %cst = arith.constant dense<0.000000e+00> : vector<32x256xf32>
    %7 = tpu.matmul %6, %4, %cst {dimension_numbers = #tpu.dot_dimension_numbers<[1], [0], [0], [1], [0, 0, 1, 1], [], []>} : vector<32x4xf32>, vector<4x256xf32>, vector<32x256xf32> -> vector<32x256xf32>
    %cst_6 = arith.constant 0.000000e+00 : f32
    %8 = vector.broadcast %cst_6 : f32 to vector<32x256xf32>
    %9 = arith.maximumf %7, %8 : vector<32x256xf32>
    %c0_7 = arith.constant 0 : index
    %c0_8 = arith.constant 0 : index
    %10 = vector.load %arg3[%c0_7, %c0_8] : memref<1x256xf32, #tpu.memory_space<vmem>>, vector<1x256xf32>
    %11 = vector.broadcast %10 : vector<1x256xf32> to vector<32x256xf32>
    %12 = arith.mulf %9, %11 : vector<32x256xf32>
    %cst_9 = arith.constant dense<0.000000e+00> : vector<32xf32>
    %13 = vector.multi_reduction <add>, %12, %cst_9 [1] : vector<32x256xf32> to vector<32xf32>
    %c0_10 = arith.constant 0 : index
    %c0_11 = arith.constant 0 : index
    %c0_12 = arith.constant 0 : index
    %14 = vector.load %arg5[%c0_10, %c0_11, %c0_12] : memref<1x1x32xf32, #tpu.memory_space<vmem>>, vector<1x1x32xf32>
    %15 = vector.shape_cast %13 : vector<32xf32> to vector<1x1x32xf32>
    %16 = arith.addf %14, %15 : vector<1x1x32xf32>
    %c0_13 = arith.constant 0 : index
    %c0_14 = arith.constant 0 : index
    %c0_15 = arith.constant 0 : index
    %17 = vector.load %arg5[%c0_13, %c0_14, %c0_15] : memref<1x1x32xf32, #tpu.memory_space<vmem>>, vector<1x1x32xf32>
    tpu.vector_store %arg5[%c0_13, %c0_14, %c0_15], %16 {strides = array<i32>} : memref<1x1x32xf32, #tpu.memory_space<vmem>>, vector<1x1x32xf32>,
    return
  }
  func.func @transform_0(%arg0: i32, %arg1: i32) -> (i32, i32, i32) {
    %c0_i32 = arith.constant 0 : i32
    %c0_i32_0 = arith.constant 0 : i32
    %c0_i32_1 = arith.constant 0 : i32
    %c0_i32_2 = arith.constant 0 : i32
    return %c0_i32, %c0_i32_0, %c0_i32_1 : i32, i32, i32
  }
  func.func @transform_1(%arg0: i32, %arg1: i32) -> (i32, i32) {
    %c0_i32 = arith.constant 0 : i32
    %c0_i32_0 = arith.constant 0 : i32
    return %c0_i32, %arg1 : i32, i32
  }
  func.func @transform_2(%arg0: i32, %arg1: i32) -> (i32, i32, i32) {
    %c0_i32 = arith.constant 0 : i32
    %c0_i32_0 = arith.constant 0 : i32
    return %arg0, %c0_i32, %arg1 : i32, i32, i32
  }
  func.func @transform_3(%arg0: i32, %arg1: i32) -> (i32, i32, i32) {
    %c0_i32 = arith.constant 0 : i32
    %c0_i32_0 = arith.constant 0 : i32
    %c0_i32_1 = arith.constant 0 : i32
    return %arg0, %c0_i32, %c0_i32_0 : i32, i32, i32
  }
}

</mosaic_0001>

<bundles_post_ra>
// kernel: ada_conv_view.1
= control target key start
LH: loop header
LB: loop body
LE: loop exit
PB: predicated region body
PF: predicated region fallthrough
CT: control target
= control target key end

     0   :  { %8 = vsyncpa [#allocation3], 0  ;;  %s856_s0 = inlined_call_operand.vmem [shape: f32[1,32,4], index: 0, kind: input, shape index: {}]   ;;  %s857_s1 = inlined_call_operand.vmem [shape: f32[1,256], index: 1, kind: input, shape index: {}]   ;;  %s858_s2 = inlined_call_operand.vmem [shape: f32[2,4,256], index: 2, kind: input, shape index: {}]   ;;  %s859_s3 = inlined_call_operand.hbm [shape: f32[2,1,32], index: 3, kind: output, shape index: {}]  }
   0x1   :  { %10 = vsyncpa [#allocation3 + $0x1], 0  ;;  %s730_s12 = smov 0   ;;  %s732_s13 = smov 0  }
   0x2   :  { %s734_s14 = smov 0   ;;  %s736_s15 = smov 0  }
   0x3   :  { %s738_s16 = smov 0   ;;  %s740_s17 = smov 0  }
   0x4 LB: > { %s545_s18 = sadd.s32 4294967295, %s706_s17   ;;  %s546_s19 = sadd.s32 4294967294, %s706_s17   ;;  %s706_s17 = sphi %s740_s17, %s16_s17   ;;  %s702_s16 = sphi %s738_s16, %s866_s16   ;;  %s698_s15 = sphi %s736_s15, %s865_s15   ;;  %s694_s14 = sphi %s734_s14, %s864_s14   ;;  %s690_s13 = sphi %s732_s13, %s863_s13   ;;  %s686_s12 = sphi %s730_s12, %s862_s12  }
   0x5   : > { %s28_s20 = sadd.s32 1, %s702_s16  ;;  %s110_s21 = sadd.s32 1, %s694_s14 }
   0x6   : > { %p30_p0 = scmp.ge.s32.totalorder %s28_s20, 2  ;;  %p120_p1 = scmp.ne.s32.totalorder %s694_s14, %s690_s13 }
   0x7   : > { %p121_p2 = scmp.eq.s32.totalorder %s545_s18, 1  ;;  %p126_p3 = scmp.ne.s32.totalorder %s690_s13, %s686_s12 }
   0x8   : > { %s868_s20 = smov (%p30_p0, %s28_s20), 0  ;;  %p127_p5 = scmp.eq.s32.totalorder %s546_s19, 1 }
   0x9   : > { %p770_p4 = por %p121_p2, %p120_p1  ;;  %s107_s23 = ssub.s32 %s702_s16, %s868_s20 }
   0xa   : > { %p550_p6 = scmp.ge.s32.totalorder %s706_s17, 1  ;;  %p108_p7 = scmp.eq.s32.totalorder %s107_s23, 0 }
   0xb   : > { %p777_p8 = por %p127_p5, %p126_p3  ;;  %p169_p9 = scmp.lt.s32.totalorder %s706_s17, 3 }
   0xc   : > { %s783_s25 = scalar_select %p108_p7, %s694_s14, %s110_s21  }
   0xd   : > { %p170_p10 = pnand %p550_p6, %p169_p9 }
   0xe   : > { %p206_p11 = scmp.lt.s32.totalorder (!%p170_p10), %s698_s15, 1  ;;  %s198_s21 = sand.u32 (!%p170_p10), 1, %s690_s13  }
   0xf   : > { %173 = sbr.rel (%p170_p10) target bundleno = 467 (0x1d3), region = 32  ;;  %s199_s23 = scalar_lea.vmem (!%p170_p10), [#allocation2], %s198_s21 }
  0x10   : > { %s460_s28 = scalar_lea.hbm (!%p170_p10), %s859_s3, %s698_s15  ;;  %s462_s29 = sshll.u32 (!%p170_p10), %s199_s23, 4  ;;  %s463_s29 = int_to_ptr.vmem [resolvable:$true] %s462_s29 }
  0x11   : > { %s648_s8 = scalar_lea.hbm (!%p170_p10), %s859_s3, 2 }
  0x14   : > { %s207_s26 = scalar_select %p206_p11, %s698_s15, 1  ;;  %vm243_vm0 = vcmask 1043456   ;;  %v222_v1 = vld [vmem:[%s856_s0] sm:$0xff]  ;;  %vm230_vm1 = vcmask 31744   ;;  %v224_v4 = vld [vmem:[%s856_s0 + $0x10] sm:$0xff]  ;;  %v223_v5 = vld [vmem:[%s856_s0 + $0x8] sm:$0xff] }
  0x15   : > { %v225_v6 = vld [vmem:[%s856_s0 + $0x18] sm:$0xff]  ;;  %v314_v7 = vld [vmem:[%s857_s1] sm:$0x3]  ;;  %v708_v38 = vmov 0   ;;  %vm219_vm2 = vcmask 253952   ;;  %vm437_vm3 = vcmask 130112  }
  0x16   : > { %s565_s27 = sshll.u32 %s207_s26, 3  ;;  %v316_v8 = vperm.slane %v314_v7, 0  ;;  %v317_v9 = vperm.slane %v314_v7, 1  ;;  %625 = vset.pattern.permute.xlu2 %v708_v38  ;;  %626 = vset.pattern.permute.xlu0 %v708_v38  ;;  %vm441_vm4 = vcmask 195712   ;;  %vm445_vm5 = vcmask 261312   ;;  %s452_s15 = scalar_lea.sflag [#allocation3], %s198_s21 }
  0x17   : > { %s213_s30 = scalar_lea.vmem %s858_s2, %s565_s27  ;;  %627 = vset.pattern.permute.xlu1 %v708_v38 }
  0x18   : > { %v221_v0 = vld [vmem:[%s213_s30] sm:$0xff]  ;;  %s464_s30 = sshll.u32 %s460_s28, 4  ;;  %s465_s30 = int_to_ptr.hbm [resolvable:$true] %s464_s30 }
  0x19   : > { %227 = vst [vmem:[#allocation1] ss:$2 sm:$0xff] %v221_v0  ;;  %s642_s4 = sshra.s32 %s465_s30, 4  ;;  %s643_s4 = int_to_ptr.hbm [resolvable:$true] %s642_s4 }
  0x1a   : > { %s644_s5 = scalar_lea.hbm %s643_s4, 1  ;;  %p649_p1 = scmp.lt.s32.totalorder %s643_s4, %s859_s3 }
  0x1b   : > { %p645_p12 = scmp.ne.s32.totalorder %s643_s4, %s644_s5  ;;  %p650_p2 = scmp.lt.s32.totalorder %s648_s8, %s644_s5 }
  0x1d   : > { %p646_p13 = pnand %p645_p12, %p770_p4  ;;  %p651_p3 = por %p650_p2, %p649_p1 }
  0x1f   : > { %p647_p0 = pneg %p646_p13 }
  0x20   : > { %v228_v2 = vld.sshfl [vmem:[#allocation1] sm:$0xff pattern:$0x75316420]  ;;  %v229_v3 = vld.sshfl [vmem:[#allocation1 + $0x8] sm:$0xff pattern:$0x75316420] }
  0x21   : > { %553 = vmatpush.msk.msra.mxu0 %vm243_vm0, %v228_v2  ;;  %558 = vmatpush.msk.msra.mxu1 %vm243_vm0, %v229_v3  ;;  %p652_p5 = pnand %p651_p3, %p647_p0 }
  0x22   : > { %554 = vmatmul.msk.f32.vlgmr.msra.gmra.mxu0 %vm230_vm1, %v222_v1  ;;  %559 = vmatmul.msk.f32.vlgmr.msra.gmra.mxu1 %vm230_vm1, %v222_v1 }
  0x23   : > { %566 = vmatpush.msk.msra.mxu2 %vm243_vm0, %v228_v2  ;;  %567 = vmatpush.msk.msra.mxu3 %vm243_vm0, %v229_v3 }
  0x24   : > { %556 = vmatmul.msk.f32.vlgmr.msra.gmra.mxu2 %vm230_vm1, %v224_v4  ;;  %561 = vmatmul.msk.f32.vlgmr.msra.gmra.mxu3 %vm230_vm1, %v224_v4 }
  0x2a   : > { %555 = vmatmul.msk.f32.gmra.mxu0 %vm230_vm1, %v223_v5  ;;  %560 = vmatmul.msk.f32.gmra.mxu1 %vm230_vm1, %v223_v5 }
  0x2c   : > { %557 = vmatmul.msk.f32.gmra.mxu2 %vm230_vm1, %v225_v6  ;;  %562 = vmatmul.msk.f32.gmra.mxu3 %vm230_vm1, %v225_v6 }
  0x9f   : > { %v265_v10 = vpop.f32.mrf.mxu0  ;;  %v294_v11 = vpop.f32.mrf.mxu1 }
  0xa0   : > { %v306_v12 = vmax.f32 %v265_v10, 0.0  ;;  %v307_v13 = vmax.f32 %v294_v11, 0.0 }
  0xa2   : > { %v320_v14 = vmul.f32 %v316_v8, %v306_v12  ;;  %v321_v15 = vmul.f32 %v317_v9, %v307_v13 }
  0xa4   : > { %v328_v16 = vadd.f32 %v321_v15, %v320_v14  ;;  %v709_v15 = vmov 0.0  }
  0xa5   : > { %220 = vst.msk [vmem:[%s199_s23] sm:$0x1] %vm219_vm2, %v709_v15 }
  0xa6   : > { %329 = vadd.xlane.f32.xlu0 %v328_v16 }
  0xa7   : > { %v268_v17 = vpop.f32.mrf.mxu0  ;;  %v297_v18 = vpop.f32.mrf.mxu1 }
  0xa8   : > { %v308_v19 = vmax.f32 %v268_v17, 0.0  ;;  %v309_v20 = vmax.f32 %v297_v18, 0.0  ;;  %v271_v21 = vpop.f32.mrf.mxu2  ;;  %v300_v22 = vpop.f32.mrf.mxu3  ;;  %v432_v17 = vlaneseq }
  0xa9   : > { %v310_v23 = vmax.f32 %v271_v21, 0.0  ;;  %v311_v24 = vmax.f32 %v300_v22, 0.0 }
  0xaa   : > { %v322_v25 = vmul.f32 %v316_v8, %v308_v19  ;;  %v323_v26 = vmul.f32 %v317_v9, %v309_v20  ;;  %v433_v18 = vand.u32 127, %v432_v17 }
  0xab   : > { %v324_v27 = vmul.f32 %v316_v8, %v310_v23  ;;  %v325_v28 = vmul.f32 %v317_v9, %v311_v24 }
  0xac   : > { %v331_v29 = vadd.f32 %v323_v26, %v322_v25  ;;  %v435_v19 = vadd.s32 4294967288, %v433_v18  ;;  %v439_v21 = vadd.s32 4294967280, %v433_v18  ;;  %v443_v24 = vadd.s32 4294967272, %v433_v18 }
  0xad   : > { %v334_v30 = vadd.f32 %v325_v28, %v324_v27 }
  0xae   : > { %332 = vadd.xlane.f32.xlu0 %v331_v29 }
  0xaf   : > { %335 = vadd.xlane.f32.xlu1 %v334_v30  ;;  %v340_v30 = vld [vmem:[%s199_s23] sm:$0x1] }
  0xb0   : > { %v274_v31 = vpop.f32.mrf.mxu2  ;;  %v303_v32 = vpop.f32.mrf.mxu3 }
  0xb1   : > { %v312_v33 = vmax.f32 %v274_v31, 0.0  ;;  %v313_v34 = vmax.f32 %v303_v32, 0.0 }
  0xb3   : > { %v326_v35 = vmul.f32 %v316_v8, %v312_v33  ;;  %v327_v36 = vmul.f32 %v317_v9, %v313_v34 }
  0xb5   : > { %v337_v37 = vadd.f32 %v327_v36, %v326_v35 }
  0xb7   : > { %338 = vadd.xlane.f32.xlu1 %v337_v37 }
 0x119   : > { %v330_v39 = vpop.xlane.xlu0 %329 }
 0x11a   : > { %v345_v40 = vperm.slane %v330_v39, 0  ;;  %v346_v41 = vperm.slane %v330_v39, 1  ;;  %v347_v42 = vperm.slane %v330_v39, 2  ;;  %v348_v43 = vperm.slane %v330_v39, 3 }
 0x11b   : > { %v349_v44 = vperm.slane %v330_v39, 4  ;;  %v350_v45 = vperm.slane %v330_v39, 5  ;;  %v351_v46 = vperm.slane %v330_v39, 6  ;;  %v352_v47 = vperm.slane %v330_v39, 7 }
 0x11c   : > { %377 = vst [vmem:[#allocation1] ss:$9 sm:$0xff] %v345_v40 }
 0x11d   : > { %379 = vst [vmem:[#allocation1 + $0x1] ss:$9 sm:$0xff] %v346_v41 }
 0x11e   : > { %381 = vst [vmem:[#allocation1 + $0x2] ss:$9 sm:$0xff] %v347_v42 }
 0x11f   : > { %383 = vst [vmem:[#allocation1 + $0x3] ss:$9 sm:$0xff] %v348_v43 }
 0x120   : > { %385 = vst [vmem:[#allocation1 + $0x4] ss:$9 sm:$0xff] %v349_v44 }
 0x121   : > { %387 = vst [vmem:[#allocation1 + $0x5] ss:$9 sm:$0xff] %v350_v45  ;;  %v333_v48 = vpop.xlane.xlu0 %332 }
 0x122   : > { %389 = vst [vmem:[#allocation1 + $0x6] ss:$9 sm:$0xff] %v351_v46  ;;  %v353_v49 = vperm.slane %v333_v48, 0  ;;  %v354_v50 = vperm.slane %v333_v48, 1  ;;  %v355_v51 = vperm.slane %v333_v48, 2  ;;  %v356_v53 = vperm.slane %v333_v48, 3  ;;  %v336_v58 = vpop.xlane.xlu1 %335 }
 0x123   : > { %391 = vst [vmem:[#allocation1 + $0x7] ss:$9 sm:$0xff] %v352_v47  ;;  %v357_v54 = vperm.slane %v333_v48, 4  ;;  %v358_v55 = vperm.slane %v333_v48, 5  ;;  %v359_v56 = vperm.slane %v333_v48, 6  ;;  %v360_v57 = vperm.slane %v333_v48, 7 }
 0x124   : > { %v361_v59 = vperm.slane %v336_v58, 0  ;;  %v362_v60 = vperm.slane %v336_v58, 1  ;;  %v363_v61 = vperm.slane %v336_v58, 2  ;;  %v364_v63 = vperm.slane %v336_v58, 3 }
 0x125   : > { %v365_v0 = vperm.slane %v336_v58, 4  ;;  %v366_v1 = vperm.slane %v336_v58, 5  ;;  %v367_v2 = vperm.slane %v336_v58, 6  ;;  %v368_v3 = vperm.slane %v336_v58, 7 }
 0x12a   : > { %v392_v52 = vld [vmem:[#allocation1] sm:$0xff]  ;;  %v339_v4 = vpop.xlane.xlu1 %338 }
 0x12b   : > { %393 = vst [vmem:[#allocation1] ss:$9 sm:$0xff] %v353_v49  ;;  %421 = vperm.xlu2 %625, %v392_v52   ;;  %v369_v5 = vperm.slane %v339_v4, 0  ;;  %v370_v6 = vperm.slane %v339_v4, 1  ;;  %v371_v7 = vperm.slane %v339_v4, 2  ;;  %v372_v8 = vperm.slane %v339_v4, 3 }
 0x12c   : > { %394 = vst [vmem:[#allocation1 + $0x1] ss:$9 sm:$0xff] %v354_v50  ;;  %v373_v10 = vperm.slane %v339_v4, 4  ;;  %v374_v11 = vperm.slane %v339_v4, 5  ;;  %v375_v12 = vperm.slane %v339_v4, 6  ;;  %v376_v13 = vperm.slane %v339_v4, 7 }
 0x12d   : > { %395 = vst [vmem:[#allocation1 + $0x2] ss:$9 sm:$0xff] %v355_v51 }
 0x12e   : > { %396 = vst [vmem:[#allocation1 + $0x3] ss:$9 sm:$0xff] %v356_v53 }
 0x12f   : > { %397 = vst [vmem:[#allocation1 + $0x4] ss:$9 sm:$0xff] %v357_v54 }
 0x130   : > { %398 = vst [vmem:[#allocation1 + $0x5] ss:$9 sm:$0xff] %v358_v55 }
 0x131   : > { %399 = vst [vmem:[#allocation1 + $0x6] ss:$9 sm:$0xff] %v359_v56 }
 0x132   : > { %400 = vst [vmem:[#allocation1 + $0x7] ss:$9 sm:$0xff] %v360_v57 }
 0x139   : > { %v401_v62 = vld [vmem:[#allocation1] sm:$0xff] }
 0x13a   : > { %402 = vst [vmem:[#allocation1] ss:$9 sm:$0xff] %v361_v59  ;;  %424 = vperm.xlu2 %625, %v401_v62  }
 0x13b   : > { %403 = vst [vmem:[#allocation1 + $0x1] ss:$9 sm:$0xff] %v362_v60 }
 0x13c   : > { %404 = vst [vmem:[#allocation1 + $0x2] ss:$9 sm:$0xff] %v363_v61 }
 0x13d   : > { %405 = vst [vmem:[#allocation1 + $0x3] ss:$9 sm:$0xff] %v364_v63 }
 0x13e   : > { %406 = vst [vmem:[#allocation1 + $0x4] ss:$9 sm:$0xff] %v365_v0 }
 0x13f   : > { %407 = vst [vmem:[#allocation1 + $0x5] ss:$9 sm:$0xff] %v366_v1 }
 0x140   : > { %408 = vst [vmem:[#allocation1 + $0x6] ss:$9 sm:$0xff] %v367_v2 }
 0x141   : > { %409 = vst [vmem:[#allocation1 + $0x7] ss:$9 sm:$0xff] %v368_v3 }
 0x148   : > { %v410_v9 = vld [vmem:[#allocation1] sm:$0xff] }
 0x149   : > { %427 = vperm.xlu0 %626, %v410_v9   ;;  %411 = vst [vmem:[#allocation1] ss:$9 sm:$0xff] %v369_v5 }
 0x14a   : > { %412 = vst [vmem:[#allocation1 + $0x1] ss:$9 sm:$0xff] %v370_v6 }
 0x14b   : > { %413 = vst [vmem:[#allocation1 + $0x2] ss:$9 sm:$0xff] %v371_v7 }
 0x14c   : > { %414 = vst [vmem:[#allocation1 + $0x3] ss:$9 sm:$0xff] %v372_v8 }
 0x14d   : > { %415 = vst [vmem:[#allocation1 + $0x4] ss:$9 sm:$0xff] %v373_v10 }
 0x14e   : > { %416 = vst [vmem:[#allocation1 + $0x5] ss:$9 sm:$0xff] %v374_v11 }
 0x14f   : > { %417 = vst [vmem:[#allocation1 + $0x6] ss:$9 sm:$0xff] %v375_v12 }
 0x150   : > { %418 = vst [vmem:[#allocation1 + $0x7] ss:$9 sm:$0xff] %v376_v13 }
 0x157   : > { %v419_v14 = vld [vmem:[#allocation1] sm:$0xff] }
 0x158   : > { %430 = vperm.xlu1 %627, %v419_v14  }
 0x185   : > { %v422_v16 = vpop.permute.xlu2 %421 }
 0x186   : > { %v434_v26 = vperm.slane %v422_v16, %v433_v18 }
 0x194   : > { %v425_v20 = vpop.permute.xlu2 %424 }
 0x195   : > { %v436_v23 = vperm.slane %v425_v20, %v435_v19 }
 0x197   : > { %v438_v28 = vsel %vm437_vm3, %v436_v23, %v434_v26 }
 0x1bb   : > { %v428_v22 = vpop.permute.xlu0 %427 }
 0x1bc   : > { %v440_v25 = vperm.slane %v428_v22, %v439_v21 }
 0x1be   : > { %v442_v31 = vsel %vm441_vm4, %v440_v25, %v438_v28 }
 0x1ca   : > { %v431_v27 = vpop.permute.xlu1 %430 }
 0x1cb   : > { %v444_v29 = vperm.slane %v431_v27, %v443_v24 }
 0x1cd   : > { %v446_v32 = vsel %vm445_vm5, %v444_v29, %v442_v31 }
 0x1ce   : > { %v448_v33 = vadd.f32 %v446_v32, %v340_v30 }
 0x1d0   : > { %450 = vst.msk [vmem:[%s199_s23] sm:$0x1] %vm219_vm2, %v448_v33 }
 0x1d1   : > { %655 = shalt.err (!%p652_p5)
}
 0x1d2   : > { %568 = dma.vmem_to_hbm [thread:$0]  (%p770_p4), %s463_s29, 16, %s465_s30, %s452_s15  }
 0x1d3 PF: > { %p574_p6 = scmp.ge.s32.totalorder %s706_s17, 2  ;;  %s476_s11 = sand.u32 1, %s686_s12  }
 0x1d4   : > { %s477_s18 = scalar_lea.sflag [#allocation3], %s476_s11 }
 0x1d5   : > { %p571_p7 = pnand %p574_p6, %p777_p8 }
 0x1d7   : > { %p572_p9 = pneg %p571_p7 }
 0x1d9   : > { %681 = dma.done.wait (%p572_p9), %s477_s18, 16  }
 0x1da   : > { %683 = vsyncadd (%p572_p9), %s477_s18, 4294967280  ;;  %s16_s17 = sadd.s32 1, %s706_s17   ;;  %s862_s12 = smov %s690_s13 }
 0x1db   : > { %p13_p10 = scmp.ge.s32.totalorder %s16_s17, 4   ;;  %s863_s13 = smov %s694_s14 }
 0x1dc   : > { %s864_s14 = smov %s783_s25  ;;  %s865_s15 = smov %s702_s16 }
 0x1dd   : > { %s866_s16 = smov %s868_s20  ;;  %15 = sbr.rel (!%p13_p10) target bundleno = 4 (0x4), region = 81 }
 0x1e2   :  { %482 = vsyncpa [#allocation3], 1 }
 0x1e3   :  { %484 = vsyncpa [#allocation3 + $0x1], 1 }

</bundles_post_ra>
